<compile_context>
chip_gen: v7x
topology: tpu7x:2x2x1
jax: 0.10.0
libtpu: 0.0.40
codegen_flags: <defaults>
</compile_context>

<pallas_src>
import jax
import jax.numpy as jnp
from jax import lax
from jax.experimental import pallas as pl
from jax.experimental.pallas import tpu as pltpu


def _squash_kernel(x_ref, o_ref):
    # x_ref, o_ref: (G, d, hw) in VMEM.
    x = x_ref[...].astype(jnp.float32)
    sq = jnp.sum(x * x, axis=1, keepdims=True)          # (G, 1, hw), per-lane
    # m = sqrt(sq) / (1 + sq); rsqrt + reciprocal go to the EUP, leaving a single
    # full-width broadcast multiply on the VPU.
    m = sq * lax.rsqrt(sq) * pl.reciprocal(1.0 + sq)
    o_ref[...] = (x * m).astype(o_ref.dtype)


def _round_up(x, m):
    return -(-x // m) * m


def _choose_group_block(total_groups, d, hw, itemsize,
                        target_hbm_bytes=1 << 20, vmem_tile_cap=2 << 20):
    """How many capsule groups to process per grid step."""
    # Real HBM bytes per group vs. padded VMEM footprint per group
    # (d pads to a multiple of 8 sublanes, hw to a multiple of 128 lanes).
    hbm_per_group = d * hw * itemsize
    vmem_per_group = _round_up(d, 8) * _round_up(hw, 128) * itemsize
    g = max(1, target_hbm_bytes // hbm_per_group)          # amortise per-step overhead
    g = min(g, max(1, vmem_tile_cap // vmem_per_group))    # stay inside scoped VMEM
    return int(min(g, total_groups))


def squash_capsules(x, num_capsules):
    """x: (b, c, h, w) float array. Returns same shape/dtype."""
    b, c, h, w = x.shape
    assert c % num_capsules == 0, "channels must be divisible by num_capsules"
    d = c // num_capsules
    hw = h * w
    groups = b * num_capsules

    # Zero-copy view: (b, c, h, w) -> (b*num_capsules, d, h*w).
    xr = x.reshape(groups, d, hw)

    g_blk = _choose_group_block(groups, d, hw, x.dtype.itemsize)
    grid = (pl.cdiv(groups, g_blk),)   # trailing partial block is masked by Pallas

    out = pl.pallas_call(
        _squash_kernel,
        out_shape=jax.ShapeDtypeStruct((groups, d, hw), x.dtype),
        grid_spec=pltpu.PrefetchScalarGridSpec(
            num_scalar_prefetch=0,
            grid=grid,
            in_specs=[pl.BlockSpec((g_blk, d, hw), lambda i: (i, 0, 0))],
            out_specs=pl.BlockSpec((g_blk, d, hw), lambda i: (i, 0, 0)),
        ),
        compiler_params=pltpu.CompilerParams(
            dimension_semantics=("parallel",),
        ),
    )(xr)

    return out.reshape(b, c, h, w)


def squash_reference(x, num_capsules):
    """Pure-JAX reference matching the PyTorch module."""
    b, c, h, w = x.shape
    t = x.reshape(b, num_capsules, -1, h, w).astype(jnp.float32)
    sq = jnp.sum(t * t, axis=2, keepdims=True)
    scale = sq / (1.0 + sq)
    out = scale * t / jnp.sqrt(sq)
    return out.reshape(b, c, h, w).astype(x.dtype)


if __name__ == "__main__":
    num_capsules = 2
    b, c, h, w = 2, 4, 16, 16  # d = c // num_capsules = 2

    key = jax.random.PRNGKey(0)
    x = jax.random.normal(key, (b, c, h, w), dtype=jnp.float32)

    y = jax.block_until_ready(squash_capsules(x, num_capsules))

    y_ref = squash_reference(x, num_capsules)
    assert y.shape == x.shape and y.dtype == x.dtype
    assert jnp.allclose(y, y_ref, atol=1e-5, rtol=1e-5), "mismatch vs reference"

    print("KERNEL_OK")
</pallas_src>

<mosaic_0001>
module attributes {stable_mosaic.version = 11 : i64} {
  func.func @_squash_kernel(%arg0: i32, %arg1: memref<4x2x256xf32, #tpu.memory_space<vmem>>, %arg2: memref<4x2x256xf32, #tpu.memory_space<vmem>>) attributes {dimension_semantics = [#tpu.dimension_semantics<parallel>], iteration_bounds = array<i64: 1>, scalar_prefetch = 0 : i64, scratch_operands = 0 : i64, tpu.core_type = #tpu.core_type<tc>, window_params = [{transform_indices = @transform_0, window_bounds = array<i64: 4, 2, 256>}, {transform_indices = @transform_1, window_bounds = array<i64: 4, 2, 256>}]} {
    %c0 = arith.constant 0 : index
    %c0_0 = arith.constant 0 : index
    %c0_1 = arith.constant 0 : index
    %0 = vector.load %arg1[%c0, %c0_0, %c0_1] : memref<4x2x256xf32, #tpu.memory_space<vmem>>, vector<4x2x256xf32>
    %1 = arith.mulf %0, %0 : vector<4x2x256xf32>
    %cst = arith.constant dense<0.000000e+00> : vector<4x256xf32>
    %2 = vector.multi_reduction <add>, %1, %cst [1] : vector<4x2x256xf32> to vector<4x256xf32>
    %3 = vector.shape_cast %2 : vector<4x256xf32> to vector<4x1x256xf32>
    %4 = math.rsqrt %3 : vector<4x1x256xf32>
    %5 = arith.mulf %3, %4 : vector<4x1x256xf32>
    %cst_2 = arith.constant 1.000000e+00 : f32
    %6 = vector.broadcast %cst_2 : f32 to vector<4x1x256xf32>
    %7 = arith.addf %6, %3 : vector<4x1x256xf32>
    %8 = tpu.reciprocal %7 : vector<4x1x256xf32> -> vector<4x1x256xf32>
    %9 = arith.mulf %5, %8 : vector<4x1x256xf32>
    %10 = vector.broadcast %9 : vector<4x1x256xf32> to vector<4x2x256xf32>
    %11 = arith.mulf %0, %10 : vector<4x2x256xf32>
    %c0_3 = arith.constant 0 : index
    %c0_4 = arith.constant 0 : index
    %c0_5 = arith.constant 0 : index
    %12 = vector.load %arg2[%c0_3, %c0_4, %c0_5] : memref<4x2x256xf32, #tpu.memory_space<vmem>>, vector<4x2x256xf32>
    tpu.vector_store %arg2[%c0_3, %c0_4, %c0_5], %11 {strides = array<i32>} : memref<4x2x256xf32, #tpu.memory_space<vmem>>, vector<4x2x256xf32>,
    return
  }
  func.func @transform_0(%arg0: i32) -> (i32, i32, i32) {
    %c0_i32 = arith.constant 0 : i32
    %c0_i32_0 = arith.constant 0 : i32
    %c0_i32_1 = arith.constant 0 : i32
    return %arg0, %c0_i32, %c0_i32_0 : i32, i32, i32
  }
  func.func @transform_1(%arg0: i32) -> (i32, i32, i32) {
    %c0_i32 = arith.constant 0 : i32
    %c0_i32_0 = arith.constant 0 : i32
    %c0_i32_1 = arith.constant 0 : i32
    return %arg0, %c0_i32, %c0_i32_0 : i32, i32, i32
  }
}

</mosaic_0001>

<bundles_post_ra>
// kernel: tpu_custom_call.1
= control target key start
LH: loop header
LB: loop body
LE: loop exit
PB: predicated region body
PF: predicated region fallthrough
CT: control target
= control target key end

     0   :  { %6 = vsyncpa [#allocation3], 0  ;;  %s409_s0 = inlined_call_operand.hbm [shape: f32[4,2,256], index: 0, kind: input, shape index: {}]   ;;  %s410_s1 = inlined_call_operand.hbm [shape: f32[4,2,256], index: 1, kind: output, shape index: {}]  }
   0x1   :  { %7 = vsyncpa [#allocation4], 0  ;;  %s326_s6 = smov [#allocation2]   ;;  %s278_s10 = scalar_lea.hbm %s409_s0, 256 }
   0x2   :  { %s13_s7 = sshll.u32 %s326_s6, 4  ;;  %p279_p0 = scmp.ne.s32.totalorder %s409_s0, %s278_s10  ;;  %s14_s7 = int_to_ptr.vmem [resolvable:$true] %s13_s7 }
   0x3   :  { %p282_p1 = scmp.lt.u32.totalorder %s278_s10, %s409_s0 }
   0x5   :  { %p284_p2 = pnand %p282_p1, %p279_p0 }
   0x7   :  { %287 = shalt.err (!%p284_p2)
}
   0x8   :  { %s288_s15 = scalar_lea.vmem %s14_s7, 256  ;;  %p293_p4 = scmp.lt.s32.totalorder %s14_s7, %s14_s7 }
   0x9   :  { %p289_p3 = scmp.ne.s32.totalorder %s14_s7, %s288_s15  ;;  %p294_p5 = scmp.lt.s32.totalorder %s288_s15, %s288_s15 }
   0xb   :  { %p295_p6 = por %p294_p5, %p293_p4 }
   0xd   :  { %p296_p7 = pnand %p295_p6, %p289_p3 }
   0xf   :  { %299 = shalt.err (!%p296_p7)
}
  0x10   :  { %s327_s16 = smov 64   ;;  %s328_s17 = smov 4  }
  0x11   :  { %19 = dma.hbm_to_vmem [thread:$0]  %s409_s0, 256, %s14_s7, [#allocation3], %s327_s16, %s327_s16, %s328_s17  }
  0x12   :  { %322 = dma.done.wait [#allocation3], 256  }
  0x13   :  { %323 = vsyncadd [#allocation3], 4294967040  ;;  %v38_v0 = vlaneseq  ;;  %v329_v1 = vmov 1983009808   ;;  %v358_v6 = vld [vmem:[#allocation2] sm:$0xf] }
  0x14   :  { %v36_v2 = vunpack.c.l.s4 %v329_v1  ;;  %v360_v7 = vld [vmem:[#allocation2 + $0x4] sm:$0xf]  ;;  %v362_v8 = vld [vmem:[#allocation2 + $0x8] sm:$0xf]  ;;  %v27_v9 = vmul.f32 %v358_v6, %v358_v6  ;;  %v370_v12 = vld [vmem:[#allocation2 + $0xc] sm:$0xf] }
  0x15   :  { %v39_v3 = vshrl.u32 %v38_v0, 7  ;;  %v28_v10 = vmul.f32 %v360_v7, %v360_v7  ;;  %v29_v11 = vmul.f32 %v362_v8, %v362_v8  ;;  %vm75_vm0 = vcmask 1041408   ;;  %s330_s0 = smov [#allocation5]  }
  0x16   :  { %v37_v4 = vunpack.c.0.s8 %v36_v2  ;;  %v30_v13 = vmul.f32 %v370_v12, %v370_v12  ;;  %s229_s20 = sshll.u32 %s330_s0, 4  ;;  %s230_s20 = int_to_ptr.vmem [resolvable:$true] %s229_s20 }
  0x17   :  { %s300_s21 = scalar_lea.vmem %s230_s20, 256  ;;  %p305_p9 = scmp.lt.s32.totalorder %s230_s20, %s230_s20 }
  0x18   :  { %v356_v5 = vsub.s32 %v37_v4, %v39_v3  ;;  %p301_p8 = scmp.ne.s32.totalorder %s230_s20, %s300_s21  ;;  %p306_p10 = scmp.lt.s32.totalorder %s300_s21, %s300_s21 }
  0x1a   :  { %v41_v14 = vrot.slane %v27_v9, %v356_v5  ;;  %v49_v15 = vrot.slane %v28_v10, %v356_v5  ;;  %v57_v16 = vrot.slane %v29_v11, %v356_v5  ;;  %v65_v17 = vrot.slane %v30_v13, %v356_v5  ;;  %p307_p11 = por %p306_p10, %p305_p9 }
  0x1c   :  { %v42_v18 = vcombine.high %v41_v14, %v41_v14  ;;  %v76_v19 = vsel %vm75_vm0, %v41_v14, 0.0  ;;  %v50_v20 = vcombine.high %v49_v15, %v49_v15  ;;  %v90_v21 = vsel %vm75_vm0, %v49_v15, 0.0  ;;  %p308_p12 = pnand %p307_p11, %p301_p8 }
  0x1d   :  { %v77_v22 = vrot.slane %v76_v19, 4  ;;  %v91_v23 = vrot.slane %v90_v21, 4  ;;  %v58_v24 = vcombine.high %v57_v16, %v57_v16  ;;  %v104_v25 = vsel %vm75_vm0, %v57_v16, 0.0 }
  0x1e   :  { %v83_v26 = vsel %vm75_vm0, %v42_v18, 0.0  ;;  %v97_v27 = vsel %vm75_vm0, %v50_v20, 0.0  ;;  %v105_v28 = vrot.slane %v104_v25, 4  ;;  %v66_v29 = vcombine.high %v65_v17, %v65_v17 }
  0x1f   :  { %v78_v30 = vadd.f32 %v77_v22, %v76_v19  ;;  %v84_v31 = vrot.slane %v83_v26, 4  ;;  %v92_v32 = vadd.f32 %v91_v23, %v90_v21  ;;  %v98_v33 = vrot.slane %v97_v27, 4 }
  0x20   :  { %v106_v34 = vadd.f32 %v105_v28, %v104_v25  ;;  %v111_v35 = vsel %vm75_vm0, %v58_v24, 0.0  ;;  %v118_v36 = vsel %vm75_vm0, %v65_v17, 0.0  ;;  %v125_v37 = vsel %vm75_vm0, %v66_v29, 0.0 }
  0x21   :  { %v79_v38 = vrot.slane %v78_v30, 2  ;;  %v85_v39 = vadd.f32 %v84_v31, %v83_v26  ;;  %v93_v40 = vrot.slane %v92_v32, 2  ;;  %v99_v41 = vadd.f32 %v98_v33, %v97_v27 }
  0x22   :  { %v107_v42 = vrot.slane %v106_v34, 2  ;;  %v112_v43 = vrot.slane %v111_v35, 4  ;;  %v119_v44 = vrot.slane %v118_v36, 4  ;;  %v126_v45 = vrot.slane %v125_v37, 4 }
  0x23   :  { %v80_v46 = vadd.f32 %v79_v38, %v78_v30  ;;  %v86_v47 = vrot.slane %v85_v39, 2  ;;  %v94_v48 = vadd.f32 %v93_v40, %v92_v32  ;;  %v100_v49 = vrot.slane %v99_v41, 2 }
  0x24   :  { %v108_v50 = vadd.f32 %v107_v42, %v106_v34  ;;  %v113_v51 = vadd.f32 %v112_v43, %v111_v35  ;;  %v120_v52 = vadd.f32 %v119_v44, %v118_v36  ;;  %v127_v53 = vadd.f32 %v126_v45, %v125_v37 }
  0x25   :  { %v81_v54 = vrot.slane %v80_v46, 1  ;;  %v87_v55 = vadd.f32 %v86_v47, %v85_v39  ;;  %v95_v56 = vrot.slane %v94_v48, 1  ;;  %v101_v57 = vadd.f32 %v100_v49, %v99_v41 }
  0x26   :  { %v109_v58 = vrot.slane %v108_v50, 1  ;;  %v114_v59 = vrot.slane %v113_v51, 2  ;;  %v121_v60 = vrot.slane %v120_v52, 2  ;;  %v128_v61 = vrot.slane %v127_v53, 2 }
  0x27   :  { %v82_v62 = vadd.f32 %v81_v54, %v80_v46  ;;  %v88_v63 = vrot.slane %v87_v55, 1  ;;  %v96_v0 = vadd.f32 %v95_v56, %v94_v48  ;;  %v102_v1 = vrot.slane %v101_v57, 1 }
  0x28   :  { %v115_v2 = vadd.f32 %v114_v59, %v113_v51  ;;  %v122_v3 = vadd.f32 %v121_v60, %v120_v52  ;;  %v129_v4 = vadd.f32 %v128_v61, %v127_v53  ;;  %v110_v13 = vadd.f32 %v109_v58, %v108_v50 }
  0x29   :  { %v89_v9 = vadd.f32 %v88_v63, %v87_v55  ;;  %246 = vrsqrt.f32 %v82_v62  ;;  %v148_v10 = vadd.f32 1.0, %v82_v62  ;;  %v103_v11 = vadd.f32 %v102_v1, %v101_v57 }
  0x2a   :  { %248 = vrsqrt.f32 %v96_v0  ;;  %v116_v14 = vrot.slane %v115_v2, 1  ;;  %v150_v16 = vadd.f32 1.0, %v96_v0  ;;  %v123_v17 = vrot.slane %v122_v3, 1 }
  0x2b   :  { %250 = vrsqrt.f32 %v89_v9  ;;  %v149_v15 = vadd.f32 1.0, %v89_v9  ;;  %v151_v18 = vadd.f32 1.0, %v103_v11  ;;  %v130_v20 = vrot.slane %v129_v4, 1 }
  0x2c   :  { %252 = vrcp.f32 %v148_v10  ;;  %v117_v19 = vadd.f32 %v116_v14, %v115_v2  ;;  %v152_v21 = vadd.f32 1.0, %v110_v13  ;;  %v124_v22 = vadd.f32 %v123_v17, %v122_v3 }
  0x2d   :  { %254 = vrcp.f32 %v149_v15  ;;  %v131_v24 = vadd.f32 %v130_v20, %v129_v4 }
  0x2e   :  { %256 = vrsqrt.f32 %v103_v11  ;;  %v153_v23 = vadd.f32 1.0, %v117_v19  ;;  %v154_v26 = vadd.f32 1.0, %v124_v22 }
  0x2f   :  { %258 = vrcp.f32 %v150_v16  ;;  %v155_v29 = vadd.f32 1.0, %v131_v24 }
  0x30   :  { %260 = vrcp.f32 %v151_v18 }
  0x31   :  { %262 = vrsqrt.f32 %v110_v13 }
  0x32   :  { %264 = vrsqrt.f32 %v117_v19 }
  0x33   :  { %v247_v25 = vpop.eup %246  ;;  %266 = vrcp.f32 %v152_v21 }
  0x34   :  { %v249_v27 = vpop.eup %248  ;;  %v140_v28 = vmul.f32 %v247_v25, %v82_v62  ;;  %268 = vrcp.f32 %v153_v23 }
  0x35   :  { %v251_v30 = vpop.eup %250  ;;  %270 = vrsqrt.f32 %v124_v22  ;;  %v142_v33 = vmul.f32 %v249_v27, %v96_v0 }
  0x36   :  { %v253_v31 = vpop.eup %252  ;;  %v141_v32 = vmul.f32 %v251_v30, %v89_v9  ;;  %272 = vrsqrt.f32 %v131_v24 }
  0x37   :  { %v255_v34 = vpop.eup %254  ;;  %v164_v35 = vmul.f32 %v253_v31, %v140_v28  ;;  %274 = vrcp.f32 %v154_v26 }
  0x38   :  { %v257_v36 = vpop.eup %256  ;;  %v165_v37 = vmul.f32 %v255_v34, %v141_v32  ;;  %276 = vrcp.f32 %v155_v29 }
  0x39   :  { %v259_v38 = vpop.eup %258  ;;  %v143_v39 = vmul.f32 %v257_v36, %v103_v11 }
  0x3a   :  { %v261_v40 = vpop.eup %260  ;;  %v180_v41 = vcombine.low %v164_v35, %v165_v37  ;;  %v166_v42 = vmul.f32 %v259_v38, %v142_v33 }
  0x3b   :  { %v263_v43 = vpop.eup %262  ;;  %v167_v44 = vmul.f32 %v261_v40, %v143_v39 }
  0x3c   :  { %v265_v45 = vpop.eup %264  ;;  %v187_v46 = vrot.slane %v180_v41, %v356_v5  ;;  %v144_v47 = vmul.f32 %v263_v43, %v110_v13 }
  0x3d   :  { %v267_v48 = vpop.eup %266  ;;  %v188_v49 = vcombine.low %v166_v42, %v167_v44  ;;  %v145_v50 = vmul.f32 %v265_v45, %v117_v19 }
  0x3e   :  { %v269_v51 = vpop.eup %268  ;;  %v216_v52 = vmul.f32 %v187_v46, %v358_v6  ;;  %v168_v53 = vmul.f32 %v267_v48, %v144_v47 }
  0x3f   :  { %v271_v54 = vpop.eup %270  ;;  %v195_v55 = vrot.slane %v188_v49, %v356_v5  ;;  %v169_v56 = vmul.f32 %v269_v51, %v145_v50 }
  0x40   :  { %v273_v57 = vpop.eup %272  ;;  %220 = vst [vmem:[#allocation5] sm:$0xf] %v216_v52  ;;  %v146_v58 = vmul.f32 %v271_v54, %v124_v22 }
  0x41   :  { %v275_v59 = vpop.eup %274  ;;  %v217_v60 = vmul.f32 %v195_v55, %v360_v7  ;;  %v196_v61 = vcombine.low %v168_v53, %v169_v56  ;;  %v147_v62 = vmul.f32 %v273_v57, %v131_v24 }
  0x42   :  { %v277_v63 = vpop.eup %276  ;;  %v170_v0 = vmul.f32 %v275_v59, %v146_v58 }
  0x43   :  { %221 = vst [vmem:[#allocation5 + $0x4] sm:$0xf] %v217_v60  ;;  %v203_v1 = vrot.slane %v196_v61, %v356_v5  ;;  %v171_v2 = vmul.f32 %v277_v63, %v147_v62 }
  0x45   :  { %v218_v6 = vmul.f32 %v203_v1, %v362_v8  ;;  %v204_v3 = vcombine.low %v170_v0, %v171_v2 }
  0x47   :  { %222 = vst [vmem:[#allocation5 + $0x8] sm:$0xf] %v218_v6  ;;  %v211_v4 = vrot.slane %v204_v3, %v356_v5 }
  0x49   :  { %v219_v9 = vmul.f32 %v211_v4, %v370_v12 }
  0x4b   :  { %223 = vst [vmem:[#allocation5 + $0xc] sm:$0xf] %v219_v9 }
  0x4c   :  { %311 = shalt.err (!%p308_p12)
}
  0x4d   :  { %s312_s24 = scalar_lea.hbm %s410_s1, 256 }
  0x4e   :  { %p313_p13 = scmp.ne.s32.totalorder %s410_s1, %s312_s24  ;;  %p316_p0 = scmp.lt.u32.totalorder %s312_s24, %s410_s1 }
  0x50   :  { %p318_p1 = pnand %p316_p0, %p313_p13 }
  0x52   :  { %321 = shalt.err (!%p318_p1)
}
  0x53   :  { %235 = dma.vmem_to_hbm [thread:$0]  %s230_s20, 256, %s410_s1, [#allocation4], %s327_s16, %s327_s16, %s328_s17  }
  0x54   :  { %324 = dma.done.wait [#allocation4], 256  }
  0x55   :  { %325 = vsyncadd [#allocation4], 4294967040 }
  0x56   :  { %239 = vsyncpa [#allocation3], 1 }
  0x57   :  { %240 = vsyncpa [#allocation4], 1 }

</bundles_post_ra>
